<compile_context>
chip_gen: v7x
topology: tpu7x:2x2x1
jax: 0.10.0
libtpu: 0.0.40
codegen_flags: <defaults>
</compile_context>

<pallas_src>
import numpy as np
import jax
import jax.numpy as jnp
from jax import lax
from jax.experimental import pallas as pl
from jax.experimental.pallas import tpu as pltpu


_VMEM_LIMIT = 32 * 1024 * 1024   # safe on v5e (128 MiB), v6e (128 MiB), v7x (64 MiB)


# ----------------------------- kernels -----------------------------

def _gate_conv_kernel(p_ref, w_ref, b_ref, wo_ref, bo_ref, s_ref):
    """Fused xcnn+gcnn (one matmul) -> LeakyReLU -> ocnn -> sigmoid, per batch.

    p_ref : (K, P)  bf16  concatenated transposed im2col patches (P on lanes)
    w_ref : (F, K)  bf16  concatenated conv weights
    b_ref : (F, 1)  f32   xcnn_b + gcnn_b
    wo_ref: (F, 1)  f32   ocnn weight (1x1 conv to a single channel)
    bo_ref: (1, 1)  f32   ocnn bias
    s_ref : (1, P)  f32   sigmoid gate on the half-resolution grid
    """
    act = jnp.dot(w_ref[...], p_ref[...], preferred_element_type=jnp.float32)  # (F, P)
    act = act + b_ref[...]
    act = jnp.where(act >= 0, act, 0.2 * act)                                  # LeakyReLU(0.2)
    z = jnp.sum(act * wo_ref[...], axis=0, keepdims=True) + bo_ref[...]        # (1, P)
    s_ref[...] = 1.0 / (1.0 + jnp.exp(-z))                                     # sigmoid


def _upsample_kernel(s_ref, uh_ref, uwT_ref, a_ref):
    """Separable 2x bilinear upsample (align_corners=False) as two MXU matmuls.

    s_ref  : (Hg, Wg) f32,  uh_ref: (H, Hg) f32,  uwT_ref: (Wg, W) f32
    a_ref  : (H, W)   x.dtype
    """
    t = jnp.dot(s_ref[...], uwT_ref[...], preferred_element_type=jnp.float32)  # (Hg, W)
    a = jnp.dot(uh_ref[...], t, preferred_element_type=jnp.float32)            # (H, W)
    a_ref[...] = a.astype(a_ref.dtype)


def _gating_multiply_kernel(a_ref, x_ref, o_ref):
    """HBM-bound gating multiply on lane-dense (c_tile, hw_tile) blocks."""
    o_ref[...] = x_ref[...] * a_ref[...]


# ----------------------------- wrapper helpers -----------------------------

def _im2col_t(inp, ksize, stride, pad, out_h, out_w):
    """(N, C, H, W) -> (N, C*k*k, out_h*out_w) transposed patches.

    Row order is (c, ky, kx), matching torch Conv2d weight.reshape(F, C*k*k).
    """
    n, c, _, _ = inp.shape
    ip = jnp.pad(inp, ((0, 0), (0, 0), (pad, pad), (pad, pad)))
    cols = []
    for ky in range(ksize):
        for kx in range(ksize):
            cols.append(ip[:, :, ky:ky + stride * out_h:stride,
                               kx:kx + stride * out_w:stride])
    pat = jnp.stack(cols, axis=2)                    # (N, C, k*k, out_h, out_w)
    return pat.reshape(n, c * ksize * ksize, out_h * out_w)


def _bilinear_2x_matrix(out_size, in_size):
    """1-D weights of nn.Upsample(scale_factor=2, mode='bilinear',
    align_corners=False) as a dense (out_size, in_size) matrix (exact PyTorch)."""
    u = np.zeros((out_size, in_size), np.float32)
    scale = in_size / out_size
    for i in range(out_size):
        real = max((i + 0.5) * scale - 0.5, 0.0)
        i0 = int(np.floor(real))
        lam = real - i0
        i1 = min(i0 + 1, in_size - 1)
        u[i, i0] += 1.0 - lam
        u[i, i1] += lam
    return u


def _pick_mul_tiles(cx, hw, itemsize, block_bytes):
    """(c_tile, hw_tile) for the gating multiply: lane-dense blocks capped at
    block_bytes, (8,128)-legal (or full-extent) on both tiled dims."""
    def fits(ct, ht):
        return ct * ht * itemsize <= block_bytes

    # Legal channel tiles: divisors of cx that are multiples of 8, plus cx itself.
    c_cands = sorted({d for d in range(1, cx + 1)
                      if cx % d == 0 and (d % 8 == 0 or d == cx)}, reverse=True)
    for ct in c_cands:                       # prefer the full (lane-dense) H*W
        if fits(ct, hw):
            return ct, hw
    # Fall back to tiling the lane axis in multiples of 128.
    ct = c_cands[-1]
    h_cands = sorted({t for t in range(128, hw, 128) if hw % t == 0}, reverse=True)
    for ht in h_cands:
        if fits(ct, ht):
            return ct, ht
    # Last resort (extreme shapes): smallest legal tiles.
    return ct, (h_cands[-1] if h_cands else hw)


# ----------------------------- forward -----------------------------

def attention_gate(g, x, params, *, compute_dtype=jnp.bfloat16,
                   block_bytes=4 * 1024 * 1024):
    """Pallas forward of AttentionGate.  g: (N, Cg, H/2, W/2), x: (N, Cx, H, W)."""
    n, cx, h, w = x.shape
    ng, cg, hg, wgs = g.shape
    assert n == ng, "batch mismatch between g and x"
    assert h % 2 == 0 and w % 2 == 0, "x spatial dims must be even"
    assert hg == h // 2 and wgs == w // 2, "g must be at half the resolution of x"

    f = params["gcnn_w"].shape[0]
    p = hg * wgs                                     # low-res pixels
    hw = h * w

    # ---- gate conv operands: fused, transposed (lane-dense), bf16 streams ----
    px_t = _im2col_t(x, 3, 2, 1, hg, wgs)            # (N, 9*Cx, P)  stride-2
    pg_t = _im2col_t(g, 3, 1, 1, hg, wgs)            # (N, 9*Cg, P)  stride-1
    patches = jnp.concatenate([px_t, pg_t], axis=1).astype(compute_dtype)
    k_tot = patches.shape[1]

    w_comb = jnp.concatenate([params["xcnn_w"].reshape(f, -1),
                              params["gcnn_w"].reshape(f, -1)],
                             axis=1).astype(compute_dtype)            # (F, K)
    b_comb = (params["xcnn_b"] + params["gcnn_b"]).reshape(f, 1).astype(jnp.float32)
    wo_col = params["ocnn_w"].reshape(f, 1).astype(jnp.float32)
    bo = params["ocnn_b"].reshape(1, 1).astype(jnp.float32)

    # ---- kernel 1: gate conv + LeakyReLU + ocnn + sigmoid (per batch) ----
    # TODO(synk): for very large H*W, tile the low-res pixel axis of this call.
    s = pl.pallas_call(
        _gate_conv_kernel,
        out_shape=jax.ShapeDtypeStruct((n, 1, p), jnp.float32),
        grid_spec=pltpu.PrefetchScalarGridSpec(
            num_scalar_prefetch=0,
            grid=(n,),
            in_specs=[
                pl.BlockSpec((None, k_tot, p), lambda b: (b, 0, 0)),   # patches
                pl.BlockSpec((f, k_tot), lambda b: (0, 0)),            # fused weights
                pl.BlockSpec((f, 1), lambda b: (0, 0)),                # fused bias
                pl.BlockSpec((f, 1), lambda b: (0, 0)),                # ocnn weight
                pl.BlockSpec((1, 1), lambda b: (0, 0)),                # ocnn bias
            ],
            out_specs=pl.BlockSpec((None, 1, p), lambda b: (b, 0, 0)),
        ),
        compiler_params=pltpu.CompilerParams(
            dimension_semantics=("parallel",),
            vmem_limit_bytes=_VMEM_LIMIT),
    )(patches, w_comb, b_comb, wo_col, bo)

    # ---- kernel 2: separable 2x bilinear upsample (per batch) ----
    uh = jnp.asarray(_bilinear_2x_matrix(h, hg))         # (H, Hg)
    uw_t = jnp.asarray(_bilinear_2x_matrix(w, wgs).T)    # (Wg, W)
    a = pl.pallas_call(
        _upsample_kernel,
        out_shape=jax.ShapeDtypeStruct((n, h, w), x.dtype),
        grid_spec=pltpu.PrefetchScalarGridSpec(
            num_scalar_prefetch=0,
            grid=(n,),
            in_specs=[
                pl.BlockSpec((None, hg, wgs), lambda b: (b, 0, 0)),    # S (Hg, Wg)
                pl.BlockSpec((h, hg), lambda b: (0, 0)),               # Uh
                pl.BlockSpec((wgs, w), lambda b: (0, 0)),              # UwT
            ],
            out_specs=pl.BlockSpec((None, h, w), lambda b: (b, 0, 0)),
        ),
        compiler_params=pltpu.CompilerParams(
            dimension_semantics=("parallel",),
            vmem_limit_bytes=_VMEM_LIMIT),
    )(s.reshape(n, hg, wgs), uh, uw_t)

    # ---- kernel 3: HBM-bound gating multiply, fully parallel grid ----
    itemsize = jnp.dtype(x.dtype).itemsize
    c_tile, hw_tile = _pick_mul_tiles(cx, hw, itemsize, block_bytes)
    x3 = x.reshape(n, cx, hw)                            # contiguous, free
    a3 = a.reshape(n, 1, hw)                             # contiguous, free

    out3 = pl.pallas_call(
        _gating_multiply_kernel,
        out_shape=jax.ShapeDtypeStruct((n, cx, hw), x.dtype),
        grid_spec=pltpu.PrefetchScalarGridSpec(
            num_scalar_prefetch=0,
            grid=(n, cx // c_tile, hw // hw_tile),
            in_specs=[
                pl.BlockSpec((None, 1, hw_tile), lambda b, c, j: (b, 0, j)),       # gate
                pl.BlockSpec((None, c_tile, hw_tile), lambda b, c, j: (b, c, j)),  # x
            ],
            out_specs=pl.BlockSpec((None, c_tile, hw_tile), lambda b, c, j: (b, c, j)),
        ),
        compiler_params=pltpu.CompilerParams(
            dimension_semantics=("parallel", "parallel", "parallel"),
            vmem_limit_bytes=_VMEM_LIMIT),
    )(a3, x3)

    return out3.reshape(n, cx, h, w)


# ----------------------------- pure-JAX reference -----------------------------

def _conv2d_nchw(inp, w, b, stride, pad):
    out = lax.conv_general_dilated(
        inp, w, window_strides=(stride, stride),
        padding=((pad, pad), (pad, pad)),
        dimension_numbers=("NCHW", "OIHW", "NCHW"))
    return out + b[None, :, None, None]


def _upsample_bilinear_2x_ref(a):
    n, c, hg, wg = a.shape
    h, w = 2 * hg, 2 * wg

    def src(out_size, in_size):
        i = jnp.arange(out_size, dtype=jnp.float32)
        real = jnp.maximum((i + 0.5) * (in_size / out_size) - 0.5, 0.0)
        i0 = jnp.floor(real).astype(jnp.int32)
        lam = real - i0.astype(jnp.float32)
        i1 = jnp.minimum(i0 + 1, in_size - 1)
        return i0, i1, lam

    y0, y1, ly = src(h, hg)
    x0, x1, lx = src(w, wg)
    rows = (a[:, :, y0, :] * (1.0 - ly)[None, None, :, None]
            + a[:, :, y1, :] * ly[None, None, :, None])
    return (rows[:, :, :, x0] * (1.0 - lx)[None, None, None, :]
            + rows[:, :, :, x1] * lx[None, None, None, :])


def _attention_gate_ref(g, x, params):
    xc = _conv2d_nchw(x, params["xcnn_w"], params["xcnn_b"], 2, 1)
    gc = _conv2d_nchw(g, params["gcnn_w"], params["gcnn_b"], 1, 1)
    a = xc + gc
    a = jnp.where(a >= 0, a, 0.2 * a)
    a = _conv2d_nchw(a, params["ocnn_w"], params["ocnn_b"], 1, 0)
    a = 1.0 / (1.0 + jnp.exp(-a))
    a = _upsample_bilinear_2x_ref(a)
    return x * a


if __name__ == "__main__":
    key = jax.random.PRNGKey(0)
    k = jax.random.split(key, 8)

    n, g_filters, x_filters, filters = 2, 6, 4, 8
    h, w = 16, 16
    hg, wg = h // 2, w // 2

    g = jax.random.normal(k[0], (n, g_filters, hg, wg), jnp.float32)
    x = jax.random.normal(k[1], (n, x_filters, h, w), jnp.float32)
    params = {
        "gcnn_w": 0.2 * jax.random.normal(k[2], (filters, g_filters, 3, 3), jnp.float32),
        "gcnn_b": 0.1 * jax.random.normal(k[3], (filters,), jnp.float32),
        "xcnn_w": 0.2 * jax.random.normal(k[4], (filters, x_filters, 3, 3), jnp.float32),
        "xcnn_b": 0.1 * jax.random.normal(k[5], (filters,), jnp.float32),
        "ocnn_w": 0.2 * jax.random.normal(k[6], (1, filters, 1, 1), jnp.float32),
        "ocnn_b": 0.1 * jax.random.normal(k[7], (1,), jnp.float32),
    }

    y = attention_gate(g, x, params)
    y = jax.block_until_ready(y)

    y_ref = _attention_gate_ref(g, x, params)
    assert y.shape == x.shape and y.dtype == x.dtype
    # Tolerance accounts for the bf16 patch/weight streams (f32 accumulation).
    assert jnp.allclose(y, y_ref, atol=1e-2, rtol=1e-2), "mismatch vs reference AttentionGate"

    print("KERNEL_OK")
</pallas_src>

<mosaic_0001>
module attributes {stable_mosaic.version = 11 : i64} {
  func.func @_gate_conv_kernel(%arg0: i32, %arg1: memref<1x90x64xbf16, #tpu.memory_space<vmem>>, %arg2: memref<8x90xbf16, #tpu.memory_space<vmem>>, %arg3: memref<8x1xf32, #tpu.memory_space<vmem>>, %arg4: memref<8x1xf32, #tpu.memory_space<vmem>>, %arg5: memref<1x1xf32, #tpu.memory_space<vmem>>, %arg6: memref<1x1x64xf32, #tpu.memory_space<vmem>>) attributes {dimension_semantics = [#tpu.dimension_semantics<parallel>], iteration_bounds = array<i64: 2>, scalar_prefetch = 0 : i64, scratch_operands = 0 : i64, tpu.core_type = #tpu.core_type<tc>, window_params = [{transform_indices = @transform_0, window_bounds = array<i64: 1, 90, 64>}, {pipeline_mode = #tpu.pipeline_mode<synchronous>, transform_indices = @transform_1, window_bounds = array<i64: 8, 90>}, {pipeline_mode = #tpu.pipeline_mode<synchronous>, transform_indices = @transform_2, window_bounds = array<i64: 8, 1>}, {pipeline_mode = #tpu.pipeline_mode<synchronous>, transform_indices = @transform_3, window_bounds = array<i64: 8, 1>}, {pipeline_mode = #tpu.pipeline_mode<synchronous>, transform_indices = @transform_4, window_bounds = array<i64: 1, 1>}, {transform_indices = @transform_5, window_bounds = array<i64: 1, 1, 64>}]} {
    %c0 = arith.constant 0 : index
    %c0_0 = arith.constant 0 : index
    %0 = vector.load %arg2[%c0, %c0_0] : memref<8x90xbf16, #tpu.memory_space<vmem>>, vector<8x90xbf16>
    %c0_1 = arith.constant 0 : index
    %c0_2 = arith.constant 0 : index
    %c0_3 = arith.constant 0 : index
    %1 = vector.load %arg1[%c0_1, %c0_2, %c0_3] : memref<1x90x64xbf16, #tpu.memory_space<vmem>>, vector<1x90x64xbf16>
    %2 = vector.shape_cast %1 : vector<1x90x64xbf16> to vector<90x64xbf16>
    %cst = arith.constant dense<0.000000e+00> : vector<8x64xf32>
    %3 = tpu.matmul %0, %2, %cst {dimension_numbers = #tpu.dot_dimension_numbers<[1], [0], [0], [1], [0, 0, 1, 1], [], []>} : vector<8x90xbf16>, vector<90x64xbf16>, vector<8x64xf32> -> vector<8x64xf32>
    %c0_4 = arith.constant 0 : index
    %c0_5 = arith.constant 0 : index
    %4 = vector.load %arg3[%c0_4, %c0_5] : memref<8x1xf32, #tpu.memory_space<vmem>>, vector<8x1xf32>
    %5 = vector.broadcast %4 : vector<8x1xf32> to vector<8x64xf32>
    %6 = arith.addf %3, %5 : vector<8x64xf32>
    %cst_6 = arith.constant 0.000000e+00 : f32
    %7 = vector.broadcast %cst_6 : f32 to vector<8x64xf32>
    %8 = arith.cmpf oge, %6, %7 : vector<8x64xf32>
    %cst_7 = arith.constant 2.000000e-01 : f32
    %9 = vector.broadcast %cst_7 : f32 to vector<8x64xf32>
    %10 = arith.mulf %9, %6 : vector<8x64xf32>
    %11 = arith.select %8, %6, %10 : vector<8x64xi1>, vector<8x64xf32>
    %c0_8 = arith.constant 0 : index
    %c0_9 = arith.constant 0 : index
    %12 = vector.load %arg4[%c0_8, %c0_9] : memref<8x1xf32, #tpu.memory_space<vmem>>, vector<8x1xf32>
    %13 = vector.broadcast %12 : vector<8x1xf32> to vector<8x64xf32>
    %14 = arith.mulf %11, %13 : vector<8x64xf32>
    %cst_10 = arith.constant dense<0.000000e+00> : vector<64xf32>
    %15 = vector.multi_reduction <add>, %14, %cst_10 [0] : vector<8x64xf32> to vector<64xf32>
    %16 = vector.shape_cast %15 : vector<64xf32> to vector<1x64xf32>
    %c0_11 = arith.constant 0 : index
    %c0_12 = arith.constant 0 : index
    %17 = vector.load %arg5[%c0_11, %c0_12] : memref<1x1xf32, #tpu.memory_space<vmem>>, vector<1x1xf32>
    %18 = vector.broadcast %17 : vector<1x1xf32> to vector<1x64xf32>
    %19 = arith.addf %16, %18 : vector<1x64xf32>
    %cst_13 = arith.constant 0.000000e+00 : f32
    %20 = vector.broadcast %cst_13 : f32 to vector<1x64xf32>
    %21 = arith.subf %20, %19 : vector<1x64xf32>
    %22 = math.exp %21 : vector<1x64xf32>
    %cst_14 = arith.constant 1.000000e+00 : f32
    %23 = vector.broadcast %cst_14 : f32 to vector<1x64xf32>
    %24 = arith.addf %23, %22 : vector<1x64xf32>
    %cst_15 = arith.constant 1.000000e+00 : f32
    %25 = vector.broadcast %cst_15 : f32 to vector<1x64xf32>
    %26 = arith.divf %25, %24 : vector<1x64xf32>
    %c0_16 = arith.constant 0 : index
    %c0_17 = arith.constant 0 : index
    %c0_18 = arith.constant 0 : index
    %27 = vector.load %arg6[%c0_16, %c0_17, %c0_18] : memref<1x1x64xf32, #tpu.memory_space<vmem>>, vector<1x1x64xf32>
    %28 = vector.shape_cast %27 : vector<1x1x64xf32> to vector<1x64xf32>
    %29 = vector.shape_cast %26 : vector<1x64xf32> to vector<1x1x64xf32>
    tpu.vector_store %arg6[%c0_16, %c0_17, %c0_18], %29 {strides = array<i32>} : memref<1x1x64xf32, #tpu.memory_space<vmem>>, vector<1x1x64xf32>,
    return
  }
  func.func @transform_0(%arg0: i32) -> (i32, i32, i32) {
    %c0_i32 = arith.constant 0 : i32
    %c0_i32_0 = arith.constant 0 : i32
    %c0_i32_1 = arith.constant 0 : i32
    return %arg0, %c0_i32, %c0_i32_0 : i32, i32, i32
  }
  func.func @transform_1(%arg0: i32) -> (i32, i32) {
    %c0_i32 = arith.constant 0 : i32
    %c0_i32_0 = arith.constant 0 : i32
    %c0_i32_1 = arith.constant 0 : i32
    return %c0_i32, %c0_i32_0 : i32, i32
  }
  func.func @transform_2(%arg0: i32) -> (i32, i32) {
    %c0_i32 = arith.constant 0 : i32
    %c0_i32_0 = arith.constant 0 : i32
    %c0_i32_1 = arith.constant 0 : i32
    return %c0_i32, %c0_i32_0 : i32, i32
  }
  func.func @transform_3(%arg0: i32) -> (i32, i32) {
    %c0_i32 = arith.constant 0 : i32
    %c0_i32_0 = arith.constant 0 : i32
    %c0_i32_1 = arith.constant 0 : i32
    return %c0_i32, %c0_i32_0 : i32, i32
  }
  func.func @transform_4(%arg0: i32) -> (i32, i32) {
    %c0_i32 = arith.constant 0 : i32
    %c0_i32_0 = arith.constant 0 : i32
    %c0_i32_1 = arith.constant 0 : i32
    return %c0_i32, %c0_i32_0 : i32, i32
  }
  func.func @transform_5(%arg0: i32) -> (i32, i32, i32) {
    %c0_i32 = arith.constant 0 : i32
    %c0_i32_0 = arith.constant 0 : i32
    %c0_i32_1 = arith.constant 0 : i32
    return %arg0, %c0_i32, %c0_i32_0 : i32, i32, i32
  }
}

</mosaic_0001>

<bundles_post_ra>
// kernel: tpu_custom_call.1
= control target key start
LH: loop header
LB: loop body
LE: loop exit
PB: predicated region body
PF: predicated region fallthrough
CT: control target
= control target key end

     0   :  { %s735_s0 = inlined_call_operand.vmem [shape: bf16[2,90,64], index: 0, kind: input, shape index: {}]   ;;  %s736_s1 = inlined_call_operand.vmem [shape: bf16[8,90], index: 1, kind: input, shape index: {}]   ;;  %s737_s2 = inlined_call_operand.vmem [shape: f32[8,1], index: 2, kind: input, shape index: {}]   ;;  %s738_s3 = inlined_call_operand.vmem [shape: f32[8,1], index: 3, kind: input, shape index: {}]   ;;  %s739_s4 = inlined_call_operand.<no memory space> [shape: f32[1,1], index: 4, kind: input, shape index: {}]   ;;  %s740_s5 = inlined_call_operand.hbm [shape: f32[2,1,64], index: 5, kind: output, shape index: {}]  }
   0x1   :  { %v10_v0 = vstv %s739_s4 }
   0x2   :  { %11 = vst [vmem:[#allocation2] sm:$0x1] %v10_v0 }
   0x3   :  { %12 = vsyncpa [#allocation4], 0 }
   0x4   :  { %14 = vsyncpa [#allocation4 + $0x1], 0  ;;  %s626_s20 = smov 0   ;;  %s628_s21 = smov 0  }
   0x5   :  { %s630_s22 = smov 0   ;;  %s632_s23 = smov 0  }
   0x6 LB: > { %s647_s4 = sadd.s32 4294967295, %s587_s23   ;;  %s432_s24 = sadd.s32 4294967294, %s587_s23   ;;  %s587_s23 = sphi %s632_s23, %s746_s23   ;;  %s583_s22 = sphi %s630_s22, %s745_s22   ;;  %s579_s21 = sphi %s628_s21, %s744_s21   ;;  %s575_s20 = sphi %s626_s20, %s743_s20  }
   0x7   : > { %s651_s25 = sadd.s32 1, %s587_s23   ;;  %s137_s26 = sadd.s32 1, %s583_s22 }
   0x8   : > { %s134_s27 = ssub.s32 %s587_s23, %s651_s25  ;;  %p147_p0 = scmp.ne.s32.totalorder %s583_s22, %s579_s21 }
   0x9   : > { %p135_p1 = scmp.eq.s32.totalorder %s134_s27, 0  ;;  %p148_p2 = scmp.eq.s32.totalorder %s647_s4, 1 }
   0xa   : > { %p153_p3 = scmp.ne.s32.totalorder %s579_s21, %s575_s20  ;;  %p154_p4 = scmp.eq.s32.totalorder %s432_s24, 1 }
   0xb   : > { %s662_s28 = scalar_select %p135_p1, %s583_s22, %s137_s26  }
   0xc   : > { %p664_p5 = por %p148_p2, %p147_p0  ;;  %p668_p6 = por %p154_p4, %p153_p3 }
   0xd   : > { %p435_p7 = scmp.ge.s32.totalorder %s587_s23, 1  ;;  %p192_p8 = scmp.lt.s32.totalorder %s587_s23, 3 }
   0xf   : > { %p193_p9 = pnand %p435_p7, %p192_p8 }
  0x10   : > { %p219_p10 = scmp.lt.s32.totalorder (!%p193_p9), %s647_s4, 1  ;;  %v589_v1 = vmov (!%p193_p9), 0.0   ;;  %vm590_vm0 = vmmov (!%p193_p9), 0   ;;  %v238_v2 = vld [vmem:[%s737_s2] sm:$0xff] (!%p193_p9)  ;;  %v591_v4 = vmov (!%p193_p9), 0   ;;  %vm283_vm1 = vcmask (!%p193_p9), 1044480  }
  0x11   : > { %196 = sbr.rel (%p193_p9) target bundleno = 329 (0x149), region = 40  ;;  %454 = vmatprep.subr.bf16.mxu0 (!%p193_p9), %v589_v1  ;;  %466 = vmatprep.mubr.msk.bf16.mxu0 (!%p193_p9), %vm590_vm0, %v589_v1  ;;  %v345_v3 = vld [vmem:[#allocation2] sm:$0x1] (!%p193_p9)  ;;  %vm279_vm2 = vcmask (!%p193_p9), 736256   ;;  %vm337_vm4 = vcmask (!%p193_p9), 523264   ;;  %v351_v23 = vlaneseq (!%p193_p9)  ;;  %s217_s17 = sand.u32 (!%p193_p9), 1, %s579_s21  }
  0x12   : > { %513 = vset.pattern.permute.xlu0 (!%p193_p9), %v591_v4  ;;  %514 = vset.pattern.permute.xlu1 (!%p193_p9), %v591_v4  ;;  %v330_v5 = vld [vmem:[%s738_s3] sm:$0xff] (!%p193_p9)  ;;  %s444_s18 = sshll.u32 (!%p193_p9), %s647_s4, 4  ;;  %s218_s19 = scalar_lea.vmem (!%p193_p9), [#allocation3], %s217_s17  ;;  %vm362_vm5 = vcmask (!%p193_p9), 516096  }
  0x13   : > { %241 = vperm.xlu0 (!%p193_p9), %513, %v238_v2   ;;  %348 = vperm.xlu1 (!%p193_p9), %514, %v345_v3   ;;  %v225_v13 = vld [vmem:[%s736_s1] sm:$0xf] (!%p193_p9)  ;;  %v352_v27 = vshrl.u32 (!%p193_p9), %v351_v23, 7  ;;  %s377_s24 = sshll.u32 (!%p193_p9), %s218_s19, 4  ;;  %s693_s6 = scalar_lea.hbm (!%p193_p9), %s740_s5, %s444_s18  ;;  %s695_s24 = int_to_ptr.vmem [resolvable:$true] %s377_s24 }
  0x14   : > { %s365_s7 = scalar_lea.sflag (!%p193_p9), [#allocation4], %s217_s17 }
  0x15   : > { %v353_v29 = vsub.s32 (!%p193_p9), 0, %v352_v27 }
  0x17   : > { %333 = vperm.xlu0 (!%p193_p9), %513, %v330_v5  }
  0x18   : > { %s220_s8 = scalar_select %p219_p10, %s647_s4, 1 }
  0x19   : > { %s592_s4 = smov [#allocation3]  }
  0x1a   : > { %s470_s9 = smul.u32 48, %s220_s8  ;;  %s525_s8 = scalar_lea.vmem %s695_s24, 16 }
  0x1b   : > { %p526_p11 = scmp.ne.s32.totalorder %s695_s24, %s525_s8 }
  0x1c   : > { %s223_s14 = scalar_lea.vmem %s735_s0, %s470_s9  ;;  %s529_s9 = sshll.u32 %s592_s4, 4  ;;  %s530_s9 = int_to_ptr.vmem [resolvable:$false] %s529_s9 }
  0x1d   : > { %v515_v6 = vld [vmem:[%s223_s14] sm:$0xff]   ;;  %v516_v7 = vld [vmem:[%s223_s14 + $0x8] sm:$0xff]   ;;  %v517_v8 = vld [vmem:[%s223_s14 + $0x10] sm:$0xff]   ;;  %p527_p12 = pnand %p526_p11, %p664_p5  ;;  %s531_s10 = scalar_lea.vmem %s530_s9, 32 }
  0x1e   : > { %455 = vmatpush3.bf16.msra.mxu0 %v515_v6  ;;  %v518_v9 = vld [vmem:[%s223_s14 + $0x18] sm:$0xff]   ;;  %v519_v10 = vld [vmem:[%s223_s14 + $0x20] sm:$0xff]   ;;  %v520_v11 = vld [vmem:[%s223_s14 + $0x28] sm:$0x1f]   ;;  %p532_p0 = scmp.lt.s32.totalorder %s695_s24, %s530_s9  ;;  %p533_p1 = scmp.lt.s32.totalorder %s531_s10, %s525_s8 }
  0x1f   : > { %456 = vmatprep.subr.bf16.mxu0 %v589_v1  ;;  %v285_v12 = vsel %vm283_vm1, %v520_v11, 0  ;;  %p528_p13 = pneg %p527_p12 }
  0x20   : > { %p534_p2 = por %p533_p1, %p532_p0 }
  0x22   : > { %457 = vmatpush3.bf16.msra.mxu0 %v516_v7  ;;  %p535_p3 = pnand %p534_p2, %p528_p13 }
  0x23   : > { %458 = vmatprep.subr.bf16.mxu0 %v589_v1 }
  0x26   : > { %459 = vmatpush3.bf16.msra.mxu0 %v517_v8 }
  0x27   : > { %460 = vmatprep.subr.bf16.mxu0 %v589_v1 }
  0x2a   : > { %461 = vmatpush3.bf16.msra.mxu0 %v518_v9 }
  0x2b   : > { %462 = vmatprep.subr.bf16.mxu0 %v589_v1 }
  0x2e   : > { %463 = vmatpush3.bf16.msra.mxu0 %v519_v10 }
  0x2f   : > { %464 = vmatprep.subr.bf16.mxu0 %v589_v1 }
  0x32   : > { %465 = vmatpush3.bf16.msra.mxu0 %v285_v12 }
  0x35   : > { %467 = vmatmul.mubr.msk.bf16.vlgmr.msra.gmra.mrb[0].mxu0 %vm279_vm2, %v225_v13 }
  0x92   : > { %v242_v14 = vpop.permute.xlu0 %241  ;;  %v349_v31 = vpop.permute.xlu1 %348 }
  0x93   : > { %v354_v34 = vrot.slane %v349_v31, %v353_v29 }
  0x96   : > { %v334_v21 = vpop.permute.xlu0 %333 }
 0x108   : > { %v321_v15 = vpop.f32.mrb[0].mxu0 }
 0x109   : > { %v322_v16 = vadd.f32 %v321_v15, %v242_v14  ;;  %v468_v17 = vpop.f32.mrb[1].mxu0 }
 0x10a   : > { %v324_v18 = vpop.f32.mrb[2].mxu0 }
 0x10b   : > { %vm327_vm3 = vcmp.ge.f32.partialorder %v322_v16, 0.0  ;;  %v328_v19 = vmul.f32 0.2, %v322_v16  ;;  %v469_v20 = vpop.f32.mrb[3].mxu0 }
 0x10d   : > { %v329_v22 = vsel %vm327_vm3, %v322_v16, %v328_v19 }
 0x10e   : > { %v336_v24 = vmul.f32 %v334_v21, %v329_v22 }
 0x110   : > { %v338_v25 = vsel %vm337_vm4, %v336_v24, 0.0 }
 0x111   : > { %v339_v26 = vrot.slane %v338_v25, 4 }
 0x113   : > { %v340_v28 = vadd.f32 %v339_v26, %v338_v25 }
 0x115   : > { %v341_v30 = vrot.slane %v340_v28, 2 }
 0x117   : > { %v342_v32 = vadd.f32 %v341_v30, %v340_v28 }
 0x119   : > { %v343_v33 = vrot.slane %v342_v32, 1 }
 0x11b   : > { %v344_v35 = vadd.f32 %v343_v33, %v342_v32 }
 0x11d   : > { %v355_v36 = vadd.f32 %v354_v34, %v344_v35 }
 0x11f   : > { %v356_v37 = vsub.f32 0.0, %v355_v36 }
 0x121   : > { %v357_v38 = vmul.f32 1.442695, %v356_v37 }
 0x123   : > { %521 = vpow2.f32 %v357_v38 }
 0x12d   : > { %v522_v39 = vpop.eup %521 }
 0x12e   : > { %v359_v40 = vadd.f32 1.0, %v522_v39 }
 0x130   : > { %523 = vrcp.f32 %v359_v40 }
 0x13a   : > { %v524_v41 = vpop.eup %523 }
 0x13b   : > { %363 = vst.msk [vmem:[%s218_s19] sm:$0x1] %vm362_vm5, %v524_v41 }
 0x13c   : > { %538 = shalt.err (!%p535_p3)
}
 0x13d   : > { %s539_s11 = scalar_lea.hbm %s693_s6, 16  ;;  %s543_s14 = scalar_lea.hbm %s740_s5, 32 }
 0x13e   : > { %p540_p4 = scmp.ne.s32.totalorder %s693_s6, %s539_s11  ;;  %p544_p9 = scmp.lt.u32.totalorder %s693_s6, %s740_s5 }
 0x13f   : > { %p545_p10 = scmp.lt.u32.totalorder %s543_s14, %s539_s11  ;;  %p547_p12 = scmp.lt.u32.totalorder %s539_s11, %s693_s6 }
 0x140   : > { %p541_p7 = pnand %p540_p4, %p664_p5 }
 0x141   : > { %p546_p11 = por %p545_p10, %p544_p9 }
 0x142   : > { %p542_p8 = pneg %p541_p7 }
 0x143   : > { %p548_p13 = por %p547_p12, %p546_p11 }
 0x145   : > { %p549_p0 = pnand %p548_p13, %p542_p8 }
 0x147   : > { %552 = shalt.err (!%p549_p0)
}
 0x148   : > { %471 = dma.vmem_to_hbm [thread:$0]  (%p664_p5), %s695_s24, 16, %s693_s6, %s365_s7  }
 0x149 PF: > { %p477_p1 = scmp.ge.s32.totalorder %s587_s23, 2  ;;  %s389_s17 = sand.u32 1, %s575_s20  }
 0x14a   : > { %s390_s18 = scalar_lea.sflag [#allocation4], %s389_s17 }
 0x14b   : > { %p474_p2 = pnand %p477_p1, %p668_p6 }
 0x14d   : > { %570 = dma.done.wait (!%p474_p2), %s390_s18, 16  }
 0x14e   : > { %572 = vsyncadd (!%p474_p2), %s390_s18, 4294967280  ;;  %p17_p3 = scmp.ge.s32.totalorder %s651_s25, 4   ;;  %s743_s20 = smov %s579_s21 }
 0x14f   : > { %s744_s21 = smov %s583_s22  ;;  %s745_s22 = smov %s662_s28 }
 0x150   : > { %s746_s23 = smov %s651_s25  ;;  %19 = sbr.rel (!%p17_p3) target bundleno = 6 (0x6), region = 75 }
 0x157   :  { %394 = vsyncpa [#allocation4], 1 }
 0x158   :  { %396 = vsyncpa [#allocation4 + $0x1], 1 }

</bundles_post_ra>
